<compile_context>
chip_gen: v6e
topology: v6e:2x2x1
jax: 0.10.0
libtpu: 0.0.40
codegen_flags: <defaults>
</compile_context>

<pallas_src>
import functools

import jax
import jax.numpy as jnp
from jax.experimental import pallas as pl
from jax.experimental.pallas import tpu as pltpu


# --------------------------------------------------------------------------
# Model hyper-parameters (small, consistent with the module's __init__)
# --------------------------------------------------------------------------
B = 2                 # batch
L = 12                # input_len
N = 16                # num_nodes
C_IN = 3              # input_dim
TOD_SIZE = 48         # time_of_day_size
DOW_SIZE = 7          # day_of_week_size
EMBED_DIM = 32        # embed_dim
NODE_DIM = 32         # node_dim
TID_DIM = 32          # temp_dim_tid
DIW_DIM = 32          # temp_dim_diw
OUT_LEN = 12          # output_len
NUM_LAYER = 2         # num_layer

IN_FLAT = C_IN * L                                   # ts-emb conv-in channels (36)
HIDDEN = EMBED_DIM + NODE_DIM + TID_DIM + DIW_DIM    # hidden_dim (128)
K_PAD = 128                                          # fused lane-dense input width
OUT_PAD = 128                                        # lane-dense output width
TM_TARGET = 512                                      # max token tile

# Lane offsets of the one-hot segments inside the fused 128-lane input.
OFF_NODE = IN_FLAT                 # 36
OFF_TID = OFF_NODE + N             # 52
OFF_DIW = OFF_TID + TOD_SIZE       # 100
K_USED = OFF_DIW + DOW_SIZE        # 107
assert K_USED <= K_PAD, "fused input exceeds 128 lanes; raise K_PAD to 256"


def _round_up(x, m):
    return ((x + m - 1) // m) * m


def _choose_tm(t):
    """Token tile: >= 2 grid steps once T >= 32 so 'parallel' can use 2 TCs (v7x)."""
    if t < 32:
        return _round_up(max(t, 16), 16)
    return min(TM_TARGET, _round_up((t + 1) // 2, 16))


# --------------------------------------------------------------------------
# Pallas kernel: fused (ts-emb + gathers + concat) matmul -> MLP -> regression
# --------------------------------------------------------------------------
def _stid_kernel(num_layer,
                 x_ref,                       # [TM, K_PAD]           bf16
                 wbig_ref, bbig_ref,          # [K_PAD, H] bf16, [1, H] f32
                 w1_ref, b1_ref,              # [NL, H, H] bf16, [NL, 1, H] f32
                 w2_ref, b2_ref,              # [NL, H, H] bf16, [NL, 1, H] f32
                 wr_ref, br_ref,              # [H, OUT_PAD] bf16, [1, OUT_PAD] f32
                 out_ref):                    # [TM, OUT_PAD]         bf16
    # time_series_emb_layer + node/tid/diw gathers + torch.cat, all as one
    # bf16 MXU matmul (the one-hot lanes of x select rows of the tables
    # packed into W_big) with f32 accumulation.
    h = jnp.dot(x_ref[...], wbig_ref[...],
                preferred_element_type=jnp.float32) + bbig_ref[...]

    # encoder: num_layer x MultiLayerPerceptron with residual links
    for layer in range(num_layer):
        h1 = jnp.dot(h.astype(jnp.bfloat16), w1_ref[layer],
                     preferred_element_type=jnp.float32) + b1_ref[layer]
        h1 = jnp.maximum(h1, 0.0)             # ReLU (dropout == identity in eval)
        h2 = jnp.dot(h1.astype(jnp.bfloat16), w2_ref[layer],
                     preferred_element_type=jnp.float32) + b2_ref[layer]
        h = h + h2

    # regression_layer: lane-dense 128 output lanes (cols >= OUT_LEN are zero),
    # stored as bf16 to halve writeback bytes.
    out = jnp.dot(h.astype(jnp.bfloat16), wr_ref[...],
                  preferred_element_type=jnp.float32) + br_ref[...]
    out_ref[...] = out.astype(jnp.bfloat16)


def stid_pallas(tokens_fused, kparams):
    """tokens_fused: [T, K_PAD] bf16 -> [T, OUT_LEN] f32."""
    t = tokens_fused.shape[0]
    tm = _choose_tm(t)
    t_pad = _round_up(t, tm)
    if t_pad != t:
        tokens_fused = jnp.pad(tokens_fused, ((0, t_pad - t), (0, 0)))

    grid = (t_pad // tm,)

    out = pl.pallas_call(
        functools.partial(_stid_kernel, NUM_LAYER),
        out_shape=jax.ShapeDtypeStruct((t_pad, OUT_PAD), jnp.bfloat16),
        grid_spec=pltpu.PrefetchScalarGridSpec(
            num_scalar_prefetch=0,
            grid=grid,
            in_specs=[
                pl.BlockSpec((tm, K_PAD), lambda i: (i, 0)),
                pl.BlockSpec((K_PAD, HIDDEN), lambda i: (0, 0)),
                pl.BlockSpec((1, HIDDEN), lambda i: (0, 0)),
                pl.BlockSpec((NUM_LAYER, HIDDEN, HIDDEN), lambda i: (0, 0, 0)),
                pl.BlockSpec((NUM_LAYER, 1, HIDDEN), lambda i: (0, 0, 0)),
                pl.BlockSpec((NUM_LAYER, HIDDEN, HIDDEN), lambda i: (0, 0, 0)),
                pl.BlockSpec((NUM_LAYER, 1, HIDDEN), lambda i: (0, 0, 0)),
                pl.BlockSpec((HIDDEN, OUT_PAD), lambda i: (0, 0)),
                pl.BlockSpec((1, OUT_PAD), lambda i: (0, 0)),
            ],
            out_specs=pl.BlockSpec((tm, OUT_PAD), lambda i: (i, 0)),
        ),
        compiler_params=pltpu.CompilerParams(
            dimension_semantics=("parallel",)),   # v7x: shard tokens over 2 TCs
    )(tokens_fused,
      kparams["w_big"], kparams["b_big"],
      kparams["w1"], kparams["b1"], kparams["w2"], kparams["b2"],
      kparams["w_reg"], kparams["b_reg"])

    return out[:t, :OUT_LEN].astype(jnp.float32)


# --------------------------------------------------------------------------
# Kernel-side parameter packing (gather/concat fold + lane-dense pad + bf16)
# --------------------------------------------------------------------------
def pack_kernel_params(params):
    # W_big: rows 0:36    -> w_ts           into cols [0, 32)
    #        rows 36:52   -> node_emb table into cols [32, 64)
    #        rows 52:100  -> time-in-day    into cols [64, 96)
    #        rows 100:107 -> day-in-week    into cols [96, 128)
    w_big = jnp.zeros((K_PAD, HIDDEN), jnp.float32)
    w_big = w_big.at[:IN_FLAT, :EMBED_DIM].set(params["w_ts"])
    w_big = w_big.at[OFF_NODE:OFF_TID, EMBED_DIM:EMBED_DIM + NODE_DIM].set(
        params["node_emb"])
    w_big = w_big.at[OFF_TID:OFF_DIW,
                     EMBED_DIM + NODE_DIM:EMBED_DIM + NODE_DIM + TID_DIM].set(
        params["time_in_day_emb"])
    w_big = w_big.at[OFF_DIW:K_USED, EMBED_DIM + NODE_DIM + TID_DIM:].set(
        params["day_in_week_emb"])
    b_big = jnp.concatenate(
        [params["b_ts"], jnp.zeros((1, HIDDEN - EMBED_DIM), jnp.float32)], axis=-1)

    # Lane-dense regression weights (zero columns OUT_LEN..127).
    w_reg = jnp.zeros((HIDDEN, OUT_PAD), jnp.float32).at[:, :OUT_LEN].set(params["w_reg"])
    b_reg = jnp.zeros((1, OUT_PAD), jnp.float32).at[:, :OUT_LEN].set(params["b_reg"])

    bf = lambda a: a.astype(jnp.bfloat16)
    return {
        "w_big": bf(w_big), "b_big": b_big,
        "w1": bf(params["w1"]), "b1": params["b1"],
        "w2": bf(params["w2"]), "b2": params["b2"],
        "w_reg": bf(w_reg), "b_reg": b_reg,
    }


# --------------------------------------------------------------------------
# Full forward (cheap glue in plain JAX, hot path in the kernel)
# --------------------------------------------------------------------------
def _build_tokens(history_data):
    """Fused per-token input: [ts(36) | onehot(node,16) | onehot(tid,48) | onehot(diw,7) | 0]."""
    bsz, seq_len, num_nodes, _ = history_data.shape

    # input_data = history_data[..., :input_dim]; transpose(1,2).view(B,N,-1)
    x = jnp.transpose(history_data[..., :C_IN], (0, 2, 1, 3))        # [B, N, L, C_in]
    x = x.reshape(bsz * num_nodes, seq_len * C_IN)                   # [T, 36]

    # Index conventions follow THIS module spec: raw integer time-of-day and
    # day-of-week - 1 (data must carry ToD in [0, TOD_SIZE) and DoW in [1, DOW_SIZE]).
    tid_idx = history_data[:, -1, :, -2].astype(jnp.int32).reshape(-1)      # [T]
    diw_idx = history_data[:, -1, :, -1].astype(jnp.int32).reshape(-1) - 1  # [T]
    node_idx = jnp.tile(jnp.arange(num_nodes, dtype=jnp.int32), bsz)        # [T]

    lane = jnp.arange(K_PAD, dtype=jnp.int32)[None, :]               # [1, 128]
    onehot = ((lane == OFF_NODE + node_idx[:, None])
              | (lane == OFF_TID + tid_idx[:, None])
              | (lane == OFF_DIW + diw_idx[:, None])).astype(jnp.bfloat16)
    tokens = onehot.at[:, :IN_FLAT].set(x.astype(jnp.bfloat16))      # [T, 128]
    return tokens


def stid_forward(history_data, kparams):
    """history_data: [B, L, N, C_IN + 2] -> prediction [B, OUT_LEN, N, 1]."""
    bsz, _, num_nodes, _ = history_data.shape
    tokens = _build_tokens(history_data)                             # [T, 128] bf16
    out = stid_pallas(tokens, kparams)                               # [T, OUT_LEN] f32
    out = out.reshape(bsz, num_nodes, OUT_LEN)                       # [B, N, OUT_LEN]
    return jnp.transpose(out, (0, 2, 1))[..., None]                  # [B, OUT_LEN, N, 1]


# --------------------------------------------------------------------------
# Pure-JAX references
# --------------------------------------------------------------------------
def _gather_and_flatten(history_data, node_tbl, tid_tbl, diw_tbl):
    bsz, seq_len, num_nodes, _ = history_data.shape
    x = jnp.transpose(history_data[..., :C_IN], (0, 2, 1, 3)).reshape(
        bsz, num_nodes, seq_len * C_IN)
    tid_idx = history_data[:, -1, :, -2].astype(jnp.int32)
    diw_idx = history_data[:, -1, :, -1].astype(jnp.int32) - 1
    tid_emb = tid_tbl[tid_idx]
    diw_emb = diw_tbl[diw_idx]
    node_emb = jnp.broadcast_to(node_tbl[None], (bsz, num_nodes, NODE_DIM))
    return x, jnp.concatenate([node_emb, tid_emb, diw_emb], axis=-1)


def stid_reference_f32(history_data, params):
    """Mirrors the PyTorch module exactly, all in f32."""
    x, emb = _gather_and_flatten(history_data, params["node_emb"],
                                 params["time_in_day_emb"], params["day_in_week_emb"])
    ts_emb = x @ params["w_ts"] + params["b_ts"]
    h = jnp.concatenate([ts_emb, emb], axis=-1)
    for layer in range(NUM_LAYER):
        h1 = jnp.maximum(h @ params["w1"][layer] + params["b1"][layer], 0.0)
        h = h + (h1 @ params["w2"][layer] + params["b2"][layer])
    out = h @ params["w_reg"] + params["b_reg"]
    return jnp.transpose(out, (0, 2, 1))[..., None]


def stid_reference_bf16(history_data, params):
    """Same math with the kernel's bf16-operand / f32-accumulate / bf16-output casting."""
    bf = lambda a: a.astype(jnp.bfloat16)
    f32 = lambda a: a.astype(jnp.float32)
    x, emb = _gather_and_flatten(
        history_data,
        f32(bf(params["node_emb"])),          # tables live in W_big as bf16
        f32(bf(params["time_in_day_emb"])),
        f32(bf(params["day_in_week_emb"])))
    ts_emb = jnp.dot(bf(x), bf(params["w_ts"]),
                     preferred_element_type=jnp.float32) + params["b_ts"]
    h = jnp.concatenate([ts_emb, emb], axis=-1)
    for layer in range(NUM_LAYER):
        h1 = jnp.dot(bf(h), bf(params["w1"][layer]),
                     preferred_element_type=jnp.float32) + params["b1"][layer]
        h1 = jnp.maximum(h1, 0.0)
        h = h + jnp.dot(bf(h1), bf(params["w2"][layer]),
                        preferred_element_type=jnp.float32) + params["b2"][layer]
    out = jnp.dot(bf(h), bf(params["w_reg"]),
                  preferred_element_type=jnp.float32) + params["b_reg"]
    out = f32(bf(out))                         # kernel writes bf16 output
    return jnp.transpose(out, (0, 2, 1))[..., None]


# --------------------------------------------------------------------------
# Deterministic parameter / input construction
# --------------------------------------------------------------------------
def make_params(key):
    ks = jax.random.split(key, 10)
    scale = 0.1
    return {
        "node_emb": scale * jax.random.normal(ks[0], (N, NODE_DIM), jnp.float32),
        "time_in_day_emb": scale * jax.random.normal(ks[1], (TOD_SIZE, TID_DIM), jnp.float32),
        "day_in_week_emb": scale * jax.random.normal(ks[2], (DOW_SIZE, DIW_DIM), jnp.float32),
        # 1x1 convs stored as [in, out] matmul weights + [1, out] biases
        "w_ts": scale * jax.random.normal(ks[3], (IN_FLAT, EMBED_DIM), jnp.float32),
        "b_ts": scale * jax.random.normal(ks[4], (1, EMBED_DIM), jnp.float32),
        "w1": scale * jax.random.normal(ks[5], (NUM_LAYER, HIDDEN, HIDDEN), jnp.float32),
        "b1": scale * jax.random.normal(ks[6], (NUM_LAYER, 1, HIDDEN), jnp.float32),
        "w2": scale * jax.random.normal(ks[7], (NUM_LAYER, HIDDEN, HIDDEN), jnp.float32),
        "b2": scale * jax.random.normal(ks[8], (NUM_LAYER, 1, HIDDEN), jnp.float32),
        "w_reg": scale * jax.random.normal(ks[9], (HIDDEN, OUT_LEN), jnp.float32),
        "b_reg": jnp.zeros((1, OUT_LEN), jnp.float32),
    }


def make_history(key):
    k1, k2, k3 = jax.random.split(key, 3)
    vals = jax.random.normal(k1, (B, L, N, C_IN), jnp.float32)
    tod = jax.random.randint(k2, (B, L, N, 1), 0, TOD_SIZE).astype(jnp.float32)
    dow = jax.random.randint(k3, (B, L, N, 1), 1, DOW_SIZE + 1).astype(jnp.float32)
    return jnp.concatenate([vals, tod, dow], axis=-1)                # [B, L, N, C_IN+2]


if __name__ == "__main__":
    key = jax.random.PRNGKey(0)
    kp, kx = jax.random.split(key)
    params = make_params(kp)
    kparams = pack_kernel_params(params)
    history = make_history(kx)

    pred = jax.block_until_ready(stid_forward(history, kparams))
    ref_bf16 = jax.block_until_ready(stid_reference_bf16(history, params))
    ref_f32 = jax.block_until_ready(stid_reference_f32(history, params))

    assert pred.shape == (B, OUT_LEN, N, 1), pred.shape
    # Tight check against a reference with identical bf16/f32 casting.
    err_bf = float(jnp.max(jnp.abs(pred - ref_bf16)))
    assert jnp.allclose(pred, ref_bf16, atol=1e-2, rtol=1e-2), err_bf
    # Loose sanity check against the pure-f32 model (bf16 quantization drift).
    err_f32 = float(jnp.max(jnp.abs(pred - ref_f32)))
    assert jnp.allclose(pred, ref_f32, atol=8e-2, rtol=8e-2), err_f32
    print("KERNEL_OK")
</pallas_src>

<mosaic_0001>
module attributes {stable_mosaic.version = 11 : i64} {
  func.func @_stid_kernel(%arg0: i32, %arg1: memref<16x128xbf16, #tpu.memory_space<vmem>>, %arg2: memref<128x128xbf16, #tpu.memory_space<vmem>>, %arg3: memref<1x128xf32, #tpu.memory_space<vmem>>, %arg4: memref<2x128x128xbf16, #tpu.memory_space<vmem>>, %arg5: memref<2x1x128xf32, #tpu.memory_space<vmem>>, %arg6: memref<2x128x128xbf16, #tpu.memory_space<vmem>>, %arg7: memref<2x1x128xf32, #tpu.memory_space<vmem>>, %arg8: memref<128x128xbf16, #tpu.memory_space<vmem>>, %arg9: memref<1x128xf32, #tpu.memory_space<vmem>>, %arg10: memref<16x128xbf16, #tpu.memory_space<vmem>>) attributes {dimension_semantics = [#tpu.dimension_semantics<parallel>], iteration_bounds = array<i64: 2>, scalar_prefetch = 0 : i64, scratch_operands = 0 : i64, tpu.core_type = #tpu.core_type<tc>, window_params = [{transform_indices = @transform_0, window_bounds = array<i64: 16, 128>}, {pipeline_mode = #tpu.pipeline_mode<synchronous>, transform_indices = @transform_1, window_bounds = array<i64: 128, 128>}, {pipeline_mode = #tpu.pipeline_mode<synchronous>, transform_indices = @transform_2, window_bounds = array<i64: 1, 128>}, {pipeline_mode = #tpu.pipeline_mode<synchronous>, transform_indices = @transform_3, window_bounds = array<i64: 2, 128, 128>}, {pipeline_mode = #tpu.pipeline_mode<synchronous>, transform_indices = @transform_4, window_bounds = array<i64: 2, 1, 128>}, {pipeline_mode = #tpu.pipeline_mode<synchronous>, transform_indices = @transform_5, window_bounds = array<i64: 2, 128, 128>}, {pipeline_mode = #tpu.pipeline_mode<synchronous>, transform_indices = @transform_6, window_bounds = array<i64: 2, 1, 128>}, {pipeline_mode = #tpu.pipeline_mode<synchronous>, transform_indices = @transform_7, window_bounds = array<i64: 128, 128>}, {pipeline_mode = #tpu.pipeline_mode<synchronous>, transform_indices = @transform_8, window_bounds = array<i64: 1, 128>}, {transform_indices = @transform_9, window_bounds = array<i64: 16, 128>}]} {
    %c0 = arith.constant 0 : index
    %c0_0 = arith.constant 0 : index
    %0 = vector.load %arg1[%c0, %c0_0] : memref<16x128xbf16, #tpu.memory_space<vmem>>, vector<16x128xbf16>
    %c0_1 = arith.constant 0 : index
    %c0_2 = arith.constant 0 : index
    %1 = vector.load %arg2[%c0_1, %c0_2] : memref<128x128xbf16, #tpu.memory_space<vmem>>, vector<128x128xbf16>
    %cst = arith.constant dense<0.000000e+00> : vector<16x128xf32>
    %2 = tpu.matmul %0, %1, %cst {dimension_numbers = #tpu.dot_dimension_numbers<[1], [0], [0], [1], [0, 0, 1, 1], [], []>} : vector<16x128xbf16>, vector<128x128xbf16>, vector<16x128xf32> -> vector<16x128xf32>
    %c0_3 = arith.constant 0 : index
    %c0_4 = arith.constant 0 : index
    %3 = vector.load %arg3[%c0_3, %c0_4] : memref<1x128xf32, #tpu.memory_space<vmem>>, vector<1x128xf32>
    %4 = vector.broadcast %3 : vector<1x128xf32> to vector<16x128xf32>
    %5 = arith.addf %2, %4 : vector<16x128xf32>
    %6 = arith.truncf %5 : vector<16x128xf32> to vector<16x128xbf16>
    %c0_5 = arith.constant 0 : index
    %c0_6 = arith.constant 0 : index
    %c0_7 = arith.constant 0 : index
    %7 = vector.load %arg4[%c0_5, %c0_6, %c0_7] : memref<2x128x128xbf16, #tpu.memory_space<vmem>>, vector<1x128x128xbf16>
    %8 = vector.shape_cast %7 : vector<1x128x128xbf16> to vector<128x128xbf16>
    %cst_8 = arith.constant dense<0.000000e+00> : vector<16x128xf32>
    %9 = tpu.matmul %6, %8, %cst_8 {dimension_numbers = #tpu.dot_dimension_numbers<[1], [0], [0], [1], [0, 0, 1, 1], [], []>} : vector<16x128xbf16>, vector<128x128xbf16>, vector<16x128xf32> -> vector<16x128xf32>
    %c0_9 = arith.constant 0 : index
    %c0_10 = arith.constant 0 : index
    %c0_11 = arith.constant 0 : index
    %10 = vector.load %arg5[%c0_9, %c0_10, %c0_11] : memref<2x1x128xf32, #tpu.memory_space<vmem>>, vector<1x1x128xf32>
    %11 = vector.shape_cast %10 : vector<1x1x128xf32> to vector<1x128xf32>
    %12 = vector.broadcast %11 : vector<1x128xf32> to vector<16x128xf32>
    %13 = arith.addf %9, %12 : vector<16x128xf32>
    %cst_12 = arith.constant 0.000000e+00 : f32
    %14 = vector.broadcast %cst_12 : f32 to vector<16x128xf32>
    %15 = arith.maximumf %13, %14 : vector<16x128xf32>
    %16 = arith.truncf %15 : vector<16x128xf32> to vector<16x128xbf16>
    %c0_13 = arith.constant 0 : index
    %c0_14 = arith.constant 0 : index
    %c0_15 = arith.constant 0 : index
    %17 = vector.load %arg6[%c0_13, %c0_14, %c0_15] : memref<2x128x128xbf16, #tpu.memory_space<vmem>>, vector<1x128x128xbf16>
    %18 = vector.shape_cast %17 : vector<1x128x128xbf16> to vector<128x128xbf16>
    %cst_16 = arith.constant dense<0.000000e+00> : vector<16x128xf32>
    %19 = tpu.matmul %16, %18, %cst_16 {dimension_numbers = #tpu.dot_dimension_numbers<[1], [0], [0], [1], [0, 0, 1, 1], [], []>} : vector<16x128xbf16>, vector<128x128xbf16>, vector<16x128xf32> -> vector<16x128xf32>
    %c0_17 = arith.constant 0 : index
    %c0_18 = arith.constant 0 : index
    %c0_19 = arith.constant 0 : index
    %20 = vector.load %arg7[%c0_17, %c0_18, %c0_19] : memref<2x1x128xf32, #tpu.memory_space<vmem>>, vector<1x1x128xf32>
    %21 = vector.shape_cast %20 : vector<1x1x128xf32> to vector<1x128xf32>
    %22 = vector.broadcast %21 : vector<1x128xf32> to vector<16x128xf32>
    %23 = arith.addf %19, %22 : vector<16x128xf32>
    %24 = arith.addf %5, %23 : vector<16x128xf32>
    %25 = arith.truncf %24 : vector<16x128xf32> to vector<16x128xbf16>
    %c1 = arith.constant 1 : index
    %c0_20 = arith.constant 0 : index
    %c0_21 = arith.constant 0 : index
    %26 = vector.load %arg4[%c1, %c0_20, %c0_21] : memref<2x128x128xbf16, #tpu.memory_space<vmem>>, vector<1x128x128xbf16>
    %27 = vector.shape_cast %26 : vector<1x128x128xbf16> to vector<128x128xbf16>
    %cst_22 = arith.constant dense<0.000000e+00> : vector<16x128xf32>
    %28 = tpu.matmul %25, %27, %cst_22 {dimension_numbers = #tpu.dot_dimension_numbers<[1], [0], [0], [1], [0, 0, 1, 1], [], []>} : vector<16x128xbf16>, vector<128x128xbf16>, vector<16x128xf32> -> vector<16x128xf32>
    %c1_23 = arith.constant 1 : index
    %c0_24 = arith.constant 0 : index
    %c0_25 = arith.constant 0 : index
    %29 = vector.load %arg5[%c1_23, %c0_24, %c0_25] : memref<2x1x128xf32, #tpu.memory_space<vmem>>, vector<1x1x128xf32>
    %30 = vector.shape_cast %29 : vector<1x1x128xf32> to vector<1x128xf32>
    %31 = vector.broadcast %30 : vector<1x128xf32> to vector<16x128xf32>
    %32 = arith.addf %28, %31 : vector<16x128xf32>
    %cst_26 = arith.constant 0.000000e+00 : f32
    %33 = vector.broadcast %cst_26 : f32 to vector<16x128xf32>
    %34 = arith.maximumf %32, %33 : vector<16x128xf32>
    %35 = arith.truncf %34 : vector<16x128xf32> to vector<16x128xbf16>
    %c1_27 = arith.constant 1 : index
    %c0_28 = arith.constant 0 : index
    %c0_29 = arith.constant 0 : index
    %36 = vector.load %arg6[%c1_27, %c0_28, %c0_29] : memref<2x128x128xbf16, #tpu.memory_space<vmem>>, vector<1x128x128xbf16>
    %37 = vector.shape_cast %36 : vector<1x128x128xbf16> to vector<128x128xbf16>
    %cst_30 = arith.constant dense<0.000000e+00> : vector<16x128xf32>
    %38 = tpu.matmul %35, %37, %cst_30 {dimension_numbers = #tpu.dot_dimension_numbers<[1], [0], [0], [1], [0, 0, 1, 1], [], []>} : vector<16x128xbf16>, vector<128x128xbf16>, vector<16x128xf32> -> vector<16x128xf32>
    %c1_31 = arith.constant 1 : index
    %c0_32 = arith.constant 0 : index
    %c0_33 = arith.constant 0 : index
    %39 = vector.load %arg7[%c1_31, %c0_32, %c0_33] : memref<2x1x128xf32, #tpu.memory_space<vmem>>, vector<1x1x128xf32>
    %40 = vector.shape_cast %39 : vector<1x1x128xf32> to vector<1x128xf32>
    %41 = vector.broadcast %40 : vector<1x128xf32> to vector<16x128xf32>
    %42 = arith.addf %38, %41 : vector<16x128xf32>
    %43 = arith.addf %24, %42 : vector<16x128xf32>
    %44 = arith.truncf %43 : vector<16x128xf32> to vector<16x128xbf16>
    %c0_34 = arith.constant 0 : index
    %c0_35 = arith.constant 0 : index
    %45 = vector.load %arg8[%c0_34, %c0_35] : memref<128x128xbf16, #tpu.memory_space<vmem>>, vector<128x128xbf16>
    %cst_36 = arith.constant dense<0.000000e+00> : vector<16x128xf32>
    %46 = tpu.matmul %44, %45, %cst_36 {dimension_numbers = #tpu.dot_dimension_numbers<[1], [0], [0], [1], [0, 0, 1, 1], [], []>} : vector<16x128xbf16>, vector<128x128xbf16>, vector<16x128xf32> -> vector<16x128xf32>
    %c0_37 = arith.constant 0 : index
    %c0_38 = arith.constant 0 : index
    %47 = vector.load %arg9[%c0_37, %c0_38] : memref<1x128xf32, #tpu.memory_space<vmem>>, vector<1x128xf32>
    %48 = vector.broadcast %47 : vector<1x128xf32> to vector<16x128xf32>
    %49 = arith.addf %46, %48 : vector<16x128xf32>
    %50 = arith.truncf %49 : vector<16x128xf32> to vector<16x128xbf16>
    %c0_39 = arith.constant 0 : index
    %c0_40 = arith.constant 0 : index
    %51 = vector.load %arg10[%c0_39, %c0_40] : memref<16x128xbf16, #tpu.memory_space<vmem>>, vector<16x128xbf16>
    tpu.vector_store %arg10[%c0_39, %c0_40], %50 {strides = array<i32>} : memref<16x128xbf16, #tpu.memory_space<vmem>>, vector<16x128xbf16>,
    return
  }
  func.func @transform_0(%arg0: i32) -> (i32, i32) {
    %c0_i32 = arith.constant 0 : i32
    %c0_i32_0 = arith.constant 0 : i32
    return %arg0, %c0_i32 : i32, i32
  }
  func.func @transform_1(%arg0: i32) -> (i32, i32) {
    %c0_i32 = arith.constant 0 : i32
    %c0_i32_0 = arith.constant 0 : i32
    %c0_i32_1 = arith.constant 0 : i32
    return %c0_i32, %c0_i32_0 : i32, i32
  }
  func.func @transform_2(%arg0: i32) -> (i32, i32) {
    %c0_i32 = arith.constant 0 : i32
    %c0_i32_0 = arith.constant 0 : i32
    %c0_i32_1 = arith.constant 0 : i32
    return %c0_i32, %c0_i32_0 : i32, i32
  }
  func.func @transform_3(%arg0: i32) -> (i32, i32, i32) {
    %c0_i32 = arith.constant 0 : i32
    %c0_i32_0 = arith.constant 0 : i32
    %c0_i32_1 = arith.constant 0 : i32
    %c0_i32_2 = arith.constant 0 : i32
    return %c0_i32, %c0_i32_0, %c0_i32_1 : i32, i32, i32
  }
  func.func @transform_4(%arg0: i32) -> (i32, i32, i32) {
    %c0_i32 = arith.constant 0 : i32
    %c0_i32_0 = arith.constant 0 : i32
    %c0_i32_1 = arith.constant 0 : i32
    %c0_i32_2 = arith.constant 0 : i32
    return %c0_i32, %c0_i32_0, %c0_i32_1 : i32, i32, i32
  }
  func.func @transform_5(%arg0: i32) -> (i32, i32, i32) {
    %c0_i32 = arith.constant 0 : i32
    %c0_i32_0 = arith.constant 0 : i32
    %c0_i32_1 = arith.constant 0 : i32
    %c0_i32_2 = arith.constant 0 : i32
    return %c0_i32, %c0_i32_0, %c0_i32_1 : i32, i32, i32
  }
  func.func @transform_6(%arg0: i32) -> (i32, i32, i32) {
    %c0_i32 = arith.constant 0 : i32
    %c0_i32_0 = arith.constant 0 : i32
    %c0_i32_1 = arith.constant 0 : i32
    %c0_i32_2 = arith.constant 0 : i32
    return %c0_i32, %c0_i32_0, %c0_i32_1 : i32, i32, i32
  }
  func.func @transform_7(%arg0: i32) -> (i32, i32) {
    %c0_i32 = arith.constant 0 : i32
    %c0_i32_0 = arith.constant 0 : i32
    %c0_i32_1 = arith.constant 0 : i32
    return %c0_i32, %c0_i32_0 : i32, i32
  }
  func.func @transform_8(%arg0: i32) -> (i32, i32) {
    %c0_i32 = arith.constant 0 : i32
    %c0_i32_0 = arith.constant 0 : i32
    %c0_i32_1 = arith.constant 0 : i32
    return %c0_i32, %c0_i32_0 : i32, i32
  }
  func.func @transform_9(%arg0: i32) -> (i32, i32) {
    %c0_i32 = arith.constant 0 : i32
    %c0_i32_0 = arith.constant 0 : i32
    return %arg0, %c0_i32 : i32, i32
  }
}

</mosaic_0001>

<bundles_post_ra>
// kernel: tpu_custom_call.1
= control target key start
LH: loop header
LB: loop body
LE: loop exit
PB: predicated region body
PF: predicated region fallthrough
CT: control target
= control target key end

     0   :  { %s2234_s0 = inlined_call_operand.hbm [shape: bf16[32,128], index: 0, kind: input, shape index: {}]   ;;  %s2235_s1 = inlined_call_operand.hbm [shape: bf16[128,128], index: 1, kind: input, shape index: {}]   ;;  %s2236_s2 = inlined_call_operand.vmem [shape: f32[1,128], index: 2, kind: input, shape index: {}]   ;;  %s2237_s3 = inlined_call_operand.hbm [shape: bf16[2,128,128], index: 3, kind: input, shape index: {}]   ;;  %s2238_s4 = inlined_call_operand.vmem [shape: f32[2,1,128], index: 4, kind: input, shape index: {}]   ;;  %s2239_s5 = inlined_call_operand.hbm [shape: bf16[2,128,128], index: 5, kind: input, shape index: {}]   ;;  %s2240_s6 = inlined_call_operand.vmem [shape: f32[2,1,128], index: 6, kind: input, shape index: {}]   ;;  %s2241_s7 = inlined_call_operand.hbm [shape: bf16[128,128], index: 7, kind: input, shape index: {}]   ;;  %s2242_s8 = inlined_call_operand.vmem [shape: f32[1,128], index: 8, kind: input, shape index: {}]   ;;  %s2243_s9 = inlined_call_operand.hbm [shape: bf16[32,128], index: 9, kind: output, shape index: {}]  }
   0x1   :  { %2250 = sst [smem:[#allocation16_spill]] %s2235_s1 }
   0x2   :  { %2251 = sst [smem:[#allocation17_spill]] %s2237_s3 }
   0x3   :  { %2252 = sst [smem:[#allocation18_spill]] %s2239_s5 }
   0x4   :  { %14 = vsyncpa [#allocation3], 0 }
   0x5   :  { %16 = vsyncpa [#allocation3 + $0x1], 0 }
   0x6   :  { %17 = vsyncpa [#allocation6], 0 }
   0x7   :  { %18 = vsyncpa [#allocation9], 0 }
   0x8   :  { %19 = vsyncpa [#allocation4], 0 }
   0x9   :  { %21 = vsyncpa [#allocation4 + $0x1], 0  ;;  %s1918_s30 = smov 0   ;;  %s1920_s10 = smov 0  }
   0xa   :  { %s1922_s11 = smov 0   ;;  %s1924_s12 = smov 0  }
   0xb LB: > { %s1939_s13 = sadd.s32 4294967295, %s1854_s12   ;;  %s1244_s14 = sadd.s32 4294967294, %s1854_s12   ;;  %s1854_s12 = sphi %s1924_s12, %s2276_s12   ;;  %s1850_s11 = sphi %s1922_s11, %s2275_s11   ;;  %s1846_s10 = sphi %s1920_s10, %s2274_s10   ;;  %s1842_s30 = sphi %s1918_s30, %s2273_s30  }
   0xc   : > { %p47_p0 = scmp.ne.s32.totalorder %s1846_s10, %s1842_s30  ;;  %p2244_p1 = scmp.eq.s32.totalorder %s1939_s13, 0 }
   0xd   : > { %p239_p2 = scmp.eq.s32.totalorder %s1939_s13, 1  ;;  %p245_p3 = scmp.eq.s32.totalorder %s1244_s14, 1 }
   0xe   : > { %p1948_p4 = por %p2244_p1, %p47_p0  ;;  %p1245_p5 = scmp.ge.s32.totalorder %s1854_s12, 1 }
   0xf   : > { %p1953_p6 = por %p245_p3, %p47_p0  ;;  %p252_p7 = scmp.lt.s32.totalorder %s1854_s12, 3 }
  0x10   : > { %s2253_s15 = scalar_select %p1948_p4, 1, 0 }
  0x11   : > { %s2254_s16 = scalar_select %p1953_p6, 1, 0 }
  0x12   : > { %p1958_p8 = pnand %p1245_p5, %p252_p7  ;;  %s1856_s18 = smov [#allocation5]  }
  0x13   : > { %s264_s19 = sshll.u32 %s1856_s18, 4  ;;  %s1857_s21 = smov [#allocation8]   ;;  %s265_s19 = int_to_ptr.vmem [resolvable:$true] %s264_s19 }
  0x14   : > { %s2255_s17 = scalar_select %p1958_p8, 1, 0 }
  0x15   : > { %p1528_p9 = pneg %p1958_p8  ;;  %s296_s22 = sshll.u32 %s1857_s21, 4  ;;  %s297_s22 = int_to_ptr.vmem [resolvable:$true] %s296_s22 }
  0x16   : > { %s1858_s23 = smov [#allocation7]   ;;  %s1661_s25 = scalar_lea.vmem %s265_s19, 1024 }
  0x17   : > { %p1967_p11 = pnand %p1528_p9, %p2244_p1  ;;  %s280_s24 = sshll.u32 %s1858_s23, 4  ;;  %s281_s24 = int_to_ptr.vmem [resolvable:$true] %s280_s24 }
  0x18   : > { %p1662_p13 = scmp.ne.s32.totalorder %s265_s19, %s1661_s25  ;;  %p1669_p5 = scmp.lt.s32.totalorder %s265_s19, %s265_s19 }
  0x19   : > { %p1652_p12 = pneg %p1967_p11  ;;  %p1670_p7 = scmp.lt.s32.totalorder %s1661_s25, %s1661_s25 }
  0x1b   : > { %p1664_p0 = pnand %p1662_p13, %p1652_p12  ;;  %p1671_p9 = por %p1670_p7, %p1669_p5 }
  0x1d   : > { %p1665_p3 = pneg %p1664_p0 }
  0x1f   : > { %p1672_p10 = pnand %p1671_p9, %p1665_p3 }
  0x21   : > { %1675 = shalt.err (!%p1672_p10)
}
  0x22   : > { %s2245_s26 = smov 64   ;;  %s2246_s27 = smov 4  }
  0x23   : > { %s2257_s1 = sld [smem:[#allocation16_spill]]  ;;  %s1687_s14 = scalar_lea.vmem %s297_s22, 2048 }
  0x24   : > { %p1688_p13 = scmp.ne.s32.totalorder %s297_s22, %s1687_s14  ;;  %p1695_p3 = scmp.lt.s32.totalorder %s297_s22, %s297_s22 }
  0x25   : > { %p1696_p10 = scmp.lt.s32.totalorder %s1687_s14, %s1687_s14 }
  0x26   : > { %p1690_p0 = pnand %p1688_p13, %p1652_p12 }
  0x27   : > { %p1697_p7 = por %p1696_p10, %p1695_p3 }
  0x28   : > { %p1691_p5 = pneg %p1690_p0 }
  0x29   : > { %1531 = dma.hbm_to_vmem [thread:$0]  (!%p1967_p11), %s2257_s1, 1024, %s265_s19, [#allocation6], %s2245_s26, %s2245_s26, %s2246_s27  }
  0x2a   : > { %p1698_p9 = pnand %p1697_p7, %p1691_p5 }
  0x2c   : > { %1701 = shalt.err (!%p1698_p9)
}
  0x2d   : > { %s2258_s5 = sld [smem:[#allocation18_spill]]  ;;  %s1713_s19 = scalar_lea.vmem %s281_s24, 2048 }
  0x2e   : > { %p1714_p1 = scmp.ne.s32.totalorder %s281_s24, %s1713_s19  ;;  %p1721_p3 = scmp.lt.s32.totalorder %s281_s24, %s281_s24 }
  0x2f   : > { %p1722_p5 = scmp.lt.s32.totalorder %s1713_s19, %s1713_s19 }
  0x30   : > { %p1716_p13 = pnand %p1714_p1, %p1652_p12 }
  0x31   : > { %p1723_p10 = por %p1722_p5, %p1721_p3 }
  0x32   : > { %p1717_p0 = pneg %p1716_p13 }
  0x33   : > { %1537 = dma.hbm_to_vmem [thread:$0]  (!%p1967_p11), %s2258_s5, 2048, %s297_s22, [#allocation9], %s2245_s26, %s2245_s26, %s2246_s27  }
  0x34   : > { %p1724_p7 = pnand %p1723_p10, %p1717_p0 }
  0x36   : > { %1727 = shalt.err (!%p1724_p7)
}
  0x37   : > { %s2259_s3 = sld [smem:[#allocation17_spill]]  ;;  %s1861_s22 = smov [#allocation10]  }
  0x38   : > { %s312_s28 = sshll.u32 %s1861_s22, 4  ;;  %s313_s28 = int_to_ptr.vmem [resolvable:$true] %s312_s28 }
  0x39   : > { %s1739_s29 = scalar_lea.vmem %s313_s28, 1024  ;;  %p1747_p0 = scmp.lt.s32.totalorder %s313_s28, %s313_s28 }
  0x3a   : > { %p1740_p1 = scmp.ne.s32.totalorder %s313_s28, %s1739_s29  ;;  %p1748_p3 = scmp.lt.s32.totalorder %s1739_s29, %s1739_s29 }
  0x3c   : > { %p1742_p9 = pnand %p1740_p1, %p1652_p12  ;;  %p1749_p5 = por %p1748_p3, %p1747_p0 }
  0x3d   : > { %1534 = dma.hbm_to_vmem [thread:$0]  (!%p1967_p11), %s2259_s3, 2048, %s281_s24, [#allocation6], %s2245_s26, %s2245_s26, %s2246_s27  }
  0x3e   : > { %p1743_p13 = pneg %p1742_p9 }
  0x40   : > { %p1750_p10 = pnand %p1749_p5, %p1743_p13 }
  0x42   : > { %1753 = shalt.err (!%p1750_p10)
}
  0x43   : > { %1540 = dma.hbm_to_vmem [thread:$0]  (!%p1967_p11), %s2241_s7, 1024, %s313_s28, [#allocation9], %s2245_s26, %s2245_s26, %s2246_s27  }
  0x44   : > { %s2018_s18 = sadd.s32 1, %s1854_s12   ;;  %s34_s20 = sadd.s32 1, %s1850_s11 }
  0x45   : > { %s31_s21 = ssub.s32 %s1854_s12, %s2018_s18  ;;  %p41_p12 = scmp.ne.s32.totalorder %s1850_s11, %s1846_s10 }
  0x46   : > { %p32_p7 = scmp.eq.s32.totalorder %s31_s21, 0  ;;  %p42_p1 = scmp.eq.s32.totalorder %s1854_s12, 0 }
  0x47   : > { %p2028_p9 = por %p239_p2, %p41_p12  ;;  %p1553_p13 = scmp.lt.s32.totalorder %s1854_s12, 2 }
  0x48   : > { %s2034_s23 = scalar_select %p32_p7, %s1850_s11, %s34_s20  }
  0x49   : > { %s2260_s19 = scalar_select %p2028_p9, 1, 0 }
  0x4a   : > { %p43_p0 = por %p42_p1, %p41_p12  ;;  %s329_s25 = sand.u32 1, %s1850_s11  }
  0x4b   : > { %s1251_s22 = sshll.u32 %s329_s25, 3  ;;  %s1325_s28 = sshll.u32 %s1854_s12, 7 }
  0x4c   : > { %s2041_s14 = scalar_lea.hbm %s2234_s0, %s1325_s28  ;;  %s333_s21 = scalar_lea.vmem [#allocation2], %s1251_s22 }
  0x4d   : > { %s340_s26 = sshll.u32 %s333_s21, 4  ;;  %p2045_p2 = pnand %p1553_p13, %p43_p0  ;;  %s2043_s26 = int_to_ptr.vmem [resolvable:$true] %s340_s26 }
  0x4e   : > { %s2049_s20 = scalar_lea.sflag [#allocation3], %s329_s25  ;;  %s1754_s1 = scalar_lea.hbm %s2041_s14, 128 }
  0x4f   : > { %p1755_p11 = scmp.ne.s32.totalorder %s2041_s14, %s1754_s1  ;;  %p1756_p3 = pneg %p2045_p2 }
  0x50   : > { %s1759_s22 = scalar_lea.hbm %s2234_s0, 256  ;;  %p1760_p12 = scmp.lt.s32.totalorder %s2041_s14, %s2234_s0 }
  0x51   : > { %p1757_p5 = pnand %p1756_p3, %p1755_p11  ;;  %p1761_p7 = scmp.lt.s32.totalorder %s1759_s22, %s1754_s1 }
  0x53   : > { %p1758_p10 = pneg %p1757_p5  ;;  %p1762_p1 = por %p1761_p7, %p1760_p12 }
  0x55   : > { %p1763_p13 = pnand %p1762_p1, %p1758_p10 }
  0x57   : > { %1766 = shalt.err (!%p1763_p13)
}
  0x58   : > { %s1767_s25 = scalar_lea.vmem %s2043_s26, 128  ;;  %s1862_s3 = smov [#allocation2]  }
  0x59   : > { %p1768_p0 = scmp.ne.s32.totalorder %s2043_s26, %s1767_s25  ;;  %s1772_s5 = sshll.u32 %s1862_s3, 4  ;;  %s1773_s5 = int_to_ptr.vmem [resolvable:$false] %s1772_s5 }
  0x5a   : > { %s1774_s28 = scalar_lea.vmem %s1773_s5, 256  ;;  %p1775_p5 = scmp.lt.s32.totalorder %s2043_s26, %s1773_s5 }
  0x5b   : > { %p1770_p6 = pnand %p1768_p0, %p1756_p3  ;;  %p1776_p9 = scmp.lt.s32.totalorder %s1774_s28, %s1767_s25 }
  0x5d   : > { %p1771_p11 = pneg %p1770_p6  ;;  %p1777_p4 = por %p1776_p9, %p1775_p5 }
  0x5f   : > { %p1778_p8 = pnand %p1777_p4, %p1771_p11 }
  0x61   : > { %1781 = shalt.err (!%p1778_p8)
}
  0x62   : > { %s2262_s1 = smov 4   ;;  %s2263_s29 = smov 64  }
  0x63   : > { %1544 = dma.hbm_to_vmem [thread:$0]  (!%p2045_p2), %s2041_s14, 128, %s2043_s26, %s2049_s20, %s2263_s29, %s2263_s29, %s2262_s1  }
  0x64   : > { %p2264_p6 = scmp.ne.s32.totalorder %s2255_s17, 0 }
  0x65   : > { %s2076_s3 = sand.u32 (!%p2264_p6), 1, %s1846_s10   ;;  %p2265_p4 = scmp.ne.s32.totalorder (!%p2264_p6), %s2253_s15, 0 }
  0x66   : > { %352 = sbr.rel (%p2264_p6) target bundleno = 1376 (0x560), region = 56  ;;  %s1255_s5 = sshll.u32 (!%p2264_p6), %s2076_s3, 3 }
  0x67   : > { %s355_s22 = scalar_lea.sflag (!%p2264_p6), [#allocation3], %s2076_s3  ;;  %s2082_s27 = scalar_lea.vmem (!%p2264_p6), [#allocation2], %s1255_s5 }
  0x6b   : > { %1825 = dma.done.wait (%p2265_p4), %s355_s22, 128  }
  0x6c   : > { %1827 = vsyncadd (%p2265_p4), %s355_s22, 4294967168  ;;  %p2266_p8 = scmp.eq.s32.totalorder %s1939_s13, 0 }
  0x6e   : > { %1829 = dma.done.wait (%p2266_p8), [#allocation6], 3072   ;;  %p2267_p9 = pmov %p2266_p8 }
  0x6f   : > { %p2268_p2 = pmov %p2266_p8 }
  0x70   : > { %1831 = vsyncadd (%p2267_p9), [#allocation6], 4294964224 }
  0x71   : > { %1833 = dma.done.wait (%p2268_p2), [#allocation9], 3072   ;;  %p2269_p3 = pmov %p2268_p2 }
  0x72   : > { %v1863_v0 = vmov 0.0   ;;  %vm1864_vm0 = vmmov 0   ;;  %v1601_v1 = vld [vmem:[#allocation5 + $0x38] sm:$0xff]   ;;  %v1602_v2 = vld [vmem:[#allocation5 + $0x30] sm:$0xff]   ;;  %v1603_v3 = vld [vmem:[#allocation5 + $0x28] sm:$0xff]   ;;  %s1328_s17 = sshll.u32 %s1939_s13, 7 }
  0x73   : > { %1835 = vsyncadd (%p2269_p3), [#allocation9], 4294964224  ;;  %1388 = vmatprep.subr.bf16.mxu0 %v1863_v0  ;;  %1404 = vmatprep.mubr.msk.bf16.mxu0 %vm1864_vm0, %v1863_v0  ;;  %v1610_v4 = vld [vmem:[#allocation7 + $0x38] sm:$0xff]   ;;  %v1604_v5 = vld [vmem:[#allocation5 + $0x20] sm:$0xff]   ;;  %s2191_s20 = scalar_lea.hbm %s2243_s9, %s1328_s17  ;;  %s1120_s24 = scalar_lea.sflag [#allocation4], %s2076_s3 }
  0x74   : > { %1408 = vmatprep.subr.bf16.mxu1 %v1863_v0  ;;  %1424 = vmatprep.mubr.msk.bf16.mxu1 %vm1864_vm0, %v1863_v0  ;;  %v1611_v6 = vld [vmem:[#allocation7 + $0x30] sm:$0xff]   ;;  %v1605_v7 = vld [vmem:[#allocation5 + $0x18] sm:$0xff]   ;;  %v1612_v8 = vld [vmem:[#allocation7 + $0x28] sm:$0xff]   ;;  %p2270_p12 = scmp.ne.s32.totalorder %s2260_s19, 0  ;;  %s1865_s13 = smov [#allocation11]  }
  0x75   : > { %1389 = vmatpush3.bf16.msra.mxu0 %v1601_v1  ;;  %1409 = vmatpush3.bf16.msra.mxu1 %v1610_v4  ;;  %v1606_v9 = vld [vmem:[#allocation5 + $0x10] sm:$0xff]   ;;  %v1613_v10 = vld [vmem:[#allocation7 + $0x20] sm:$0xff]   ;;  %v1607_v11 = vld [vmem:[#allocation5 + $0x8] sm:$0xff]   ;;  %s1786_s21 = sshll.u32 %s1865_s13, 4  ;;  %s1787_s21 = int_to_ptr.vmem [resolvable:$false] %s1786_s21 }
  0x76   : > { %1390 = vmatprep.subr.bf16.mxu0 %v1863_v0  ;;  %1410 = vmatprep.subr.bf16.mxu1 %v1863_v0  ;;  %v1614_v12 = vld [vmem:[#allocation7 + $0x18] sm:$0xff]   ;;  %v1608_v13 = vld [vmem:[#allocation5] sm:$0xff]   ;;  %v1615_v14 = vld [vmem:[#allocation7 + $0x10] sm:$0xff]   ;;  %s1788_s25 = scalar_lea.vmem %s1787_s21, 256 }
  0x77   : > { %v1609_v15 = vld [vmem:[%s2082_s27] sm:$0xff]   ;;  %v1616_v16 = vld [vmem:[#allocation7 + $0x8] sm:$0xff]   ;;  %v1617_v17 = vld [vmem:[#allocation7] sm:$0xff]   ;;  %s408_s27 = scalar_lea.vmem [#allocation11], %s1255_s5 }
  0x78   : > { %v1618_v18 = vld [vmem:[#allocation8 + $0x38] sm:$0xff]   ;;  %v1619_v19 = vld [vmem:[#allocation8 + $0x30] sm:$0xff]   ;;  %v1620_v20 = vld [vmem:[#allocation8 + $0x28] sm:$0xff]   ;;  %s1133_s15 = sshll.u32 %s408_s27, 4  ;;  %s2186_s15 = int_to_ptr.vmem [resolvable:$true] %s1133_s15 }
  0x79   : > { %1391 = vmatpush3.bf16.msra.mxu0 %v1602_v2  ;;  %1411 = vmatpush3.bf16.msra.mxu1 %v1611_v6  ;;  %v1621_v21 = vld [vmem:[#allocation8 + $0x20] sm:$0xff]   ;;  %v1622_v22 = vld [vmem:[#allocation8 + $0x18] sm:$0xff]   ;;  %v1261_v24 = vld [vmem:[%s2236_s2] ss:$0 sm:$0xff]  ;;  %s1782_s5 = scalar_lea.vmem %s2186_s15, 128  ;;  %p1789_p13 = scmp.lt.s32.totalorder %s2186_s15, %s1787_s21 }
  0x7a   : > { %1392 = vmatprep.subr.bf16.mxu0 %v1863_v0  ;;  %1412 = vmatprep.subr.bf16.mxu1 %v1863_v0  ;;  %v1623_v31 = vld [vmem:[#allocation8 + $0x10] sm:$0xff]   ;;  %v1624_v32 = vld [vmem:[#allocation8 + $0x8] sm:$0xff]   ;;  %v1625_v33 = vld [vmem:[#allocation8] sm:$0xff]   ;;  %p1783_p10 = scmp.ne.s32.totalorder %s2186_s15, %s1782_s5  ;;  %p1790_p0 = scmp.lt.s32.totalorder %s1788_s25, %s1782_s5 }
  0x7b   : > { %v1626_v34 = vld [vmem:[#allocation7 + $0x78] sm:$0xff]   ;;  %v1627_v35 = vld [vmem:[#allocation7 + $0x70] sm:$0xff]   ;;  %v1628_v36 = vld [vmem:[#allocation7 + $0x68] sm:$0xff]  }
  0x7c   : > { %v1629_v37 = vld [vmem:[#allocation7 + $0x60] sm:$0xff]   ;;  %v1630_v38 = vld [vmem:[#allocation7 + $0x58] sm:$0xff]   ;;  %v1271_v39 = vld [vmem:[%s2238_s4] ss:$0 sm:$0xff]  ;;  %p1784_p7 = pnand %p1783_p10, %p2270_p12  ;;  %p1791_p11 = por %p1790_p0, %p1789_p13 }
  0x7d   : > { %1393 = vmatpush3.bf16.msra.mxu0 %v1603_v3  ;;  %1413 = vmatpush3.bf16.msra.mxu1 %v1612_v8  ;;  %v1631_v49 = vld [vmem:[#allocation7 + $0x50] sm:$0xff]   ;;  %v1632_v50 = vld [vmem:[#allocation7 + $0x48] sm:$0xff]   ;;  %v1633_v51 = vld [vmem:[#allocation7 + $0x40] sm:$0xff]  }
  0x7e   : > { %1394 = vmatprep.subr.bf16.mxu0 %v1863_v0  ;;  %1414 = vmatprep.subr.bf16.mxu1 %v1863_v0  ;;  %v1634_v52 = vld [vmem:[#allocation8 + $0x78] sm:$0xff]   ;;  %v1635_v53 = vld [vmem:[#allocation8 + $0x70] sm:$0xff]   ;;  %v1636_v54 = vld [vmem:[#allocation8 + $0x68] sm:$0xff]   ;;  %p1785_p1 = pneg %p1784_p7 }
  0x7f   : > { %v1637_v55 = vld [vmem:[#allocation8 + $0x60] sm:$0xff]   ;;  %v1638_v56 = vld [vmem:[#allocation8 + $0x58] sm:$0xff]   ;;  %v1280_v57 = vld [vmem:[%s2240_s6] ss:$0 sm:$0xff] }
  0x80   : > { %v1639_v4 = vld [vmem:[#allocation8 + $0x50] sm:$0xff]   ;;  %v1641_v6 = vld [vmem:[#allocation8 + $0x40] sm:$0xff]   ;;  %p1792_p5 = pnand %p1791_p11, %p1785_p1 }
  0x81   : > { %1395 = vmatpush3.bf16.msra.mxu0 %v1604_v5  ;;  %1415 = vmatpush3.bf16.msra.mxu1 %v1613_v10  ;;  %v1640_v5 = vld [vmem:[#allocation8 + $0x48] sm:$0xff]   ;;  %v1643_v8 = vld [vmem:[#allocation10 + $0x30] sm:$0xff]   ;;  %v1645_v10 = vld [vmem:[#allocation10 + $0x20] sm:$0xff]  }
  0x82   : > { %1396 = vmatprep.subr.bf16.mxu0 %v1863_v0  ;;  %1416 = vmatprep.subr.bf16.mxu1 %v1863_v0 }
  0x85   : > { %1397 = vmatpush3.bf16.msra.mxu0 %v1605_v7  ;;  %1417 = vmatpush3.bf16.msra.mxu1 %v1614_v12  ;;  %v1642_v7 = vld [vmem:[#allocation10 + $0x38] sm:$0xff]   ;;  %v1290_v12 = vld [vmem:[%s2238_s4 + $0x1] ss:$0 sm:$0xff] }
  0x86   : > { %1398 = vmatprep.subr.bf16.mxu0 %v1863_v0  ;;  %1418 = vmatprep.subr.bf16.mxu1 %v1863_v0 }
  0x89   : > { %1399 = vmatpush3.bf16.msra.mxu0 %v1606_v9  ;;  %1419 = vmatpush3.bf16.msra.mxu1 %v1615_v14  ;;  %v1644_v9 = vld [vmem:[#allocation10 + $0x28] sm:$0xff]  }
  0x8a   : > { %1400 = vmatprep.subr.bf16.mxu0 %v1863_v0  ;;  %1420 = vmatprep.subr.bf16.mxu1 %v1863_v0 }
  0x8d   : > { %1401 = vmatpush3.bf16.msra.mxu0 %v1607_v11  ;;  %1421 = vmatpush3.bf16.msra.mxu1 %v1616_v16  ;;  %v1646_v11 = vld [vmem:[#allocation10 + $0x18] sm:$0xff]  }
  0x8e   : > { %1402 = vmatprep.subr.bf16.mxu0 %v1863_v0  ;;  %1422 = vmatprep.subr.bf16.mxu1 %v1863_v0 }
  0x91   : > { %1403 = vmatpush3.bf16.msra.mxu0 %v1608_v13  ;;  %1423 = vmatpush3.bf16.msra.mxu1 %v1617_v17 }
  0x92   : > { %1428 = vmatprep.subr.bf16.mxu0 %v1863_v0  ;;  %1448 = vmatprep.subr.bf16.mxu1 %v1863_v0 }
  0x94   : > { %1405 = vmatmul.mubr.bf16.vlgmr.msra.gmra.mxu0 %v1609_v15 }
  0x95   : > { %1444 = vmatprep.mubr.msk.bf16.mxu0 %vm1864_vm0, %v1863_v0  ;;  %1429 = vmatpush3.bf16.msra.mxu0 %v1618_v18 }
  0x96   : > { %1430 = vmatprep.subr.bf16.mxu0 %v1863_v0 }
  0x99   : > { %1431 = vmatpush3.bf16.msra.mxu0 %v1619_v19 }
  0x9a   : > { %1432 = vmatprep.subr.bf16.mxu0 %v1863_v0 }
  0x9d   : > { %1433 = vmatpush3.bf16.msra.mxu0 %v1620_v20 }
  0x9e   : > { %1434 = vmatprep.subr.bf16.mxu0 %v1863_v0 }
  0xa1   : > { %1435 = vmatpush3.bf16.msra.mxu0 %v1621_v21 }
  0xa2   : > { %1436 = vmatprep.subr.bf16.mxu0 %v1863_v0 }
  0xa5   : > { %1437 = vmatpush3.bf16.msra.mxu0 %v1622_v22  ;;  %v1647_v22 = vld [vmem:[#allocation10 + $0x10] sm:$0xff]  }
  0xa6   : > { %1438 = vmatprep.subr.bf16.mxu0 %v1863_v0 }
  0xa9   : > { %1439 = vmatpush3.bf16.msra.mxu0 %v1623_v31 }
  0xaa   : > { %1440 = vmatprep.subr.bf16.mxu0 %v1863_v0 }
  0xad   : > { %1441 = vmatpush3.bf16.msra.mxu0 %v1624_v32 }
  0xae   : > { %1442 = vmatprep.subr.bf16.mxu0 %v1863_v0 }
  0xb1   : > { %1443 = vmatpush3.bf16.msra.mxu0 %v1625_v33 }
  0xb2   : > { %1468 = vmatprep.subr.bf16.mxu0 %v1863_v0 }
 0x154   : > { %v525_v23 = vpop.f32.mrf.mxu0 }
 0x155   : > { %v2129_v27 = vadd.f32 %v1261_v24, %v525_v23  ;;  %v1648_v23 = vld [vmem:[#allocation10 + $0x8] sm:$0xff]  }
 0x156   : > { %v1406_v25 = vpop.f32.mrf.mxu0 }
 0x157   : > { %v1300_v25 = vld [vmem:[%s2240_s6 + $0x1] ss:$0 sm:$0xff] }
 0x158   : > { %v528_v26 = vpop.f32.mrf.mxu0 }
 0x159   : > { %v2131_v28 = vadd.f32 %v1261_v24, %v528_v26  ;;  %v1649_v24 = vld [vmem:[#allocation10] sm:$0xff]  }
 0x15a   : > { %v1407_v29 = vpop.f32.mrf.mxu0 }
 0x15b   : > { %v532_v30 = vpack.c.bf16 %v2131_v28, %v2129_v27 }
 0x15d   : > { %1425 = vmatmul.mubr.bf16.vlgmr.msra.gmra.mxu1 %v532_v30 }
 0x15e   : > { %1464 = vmatprep.mubr.msk.bf16.mxu1 %vm1864_vm0, %v1863_v0  ;;  %1449 = vmatpush3.bf16.msra.mxu1 %v1626_v34 }
 0x15f   : > { %1450 = vmatprep.subr.bf16.mxu1 %v1863_v0 }
 0x162   : > { %1451 = vmatpush3.bf16.msra.mxu1 %v1627_v35  ;;  %v1309_v35 = vld [vmem:[%s2242_s8] ss:$0 sm:$0xff] }
 0x163   : > { %1452 = vmatprep.subr.bf16.mxu1 %v1863_v0 }
 0x166   : > { %1453 = vmatpush3.bf16.msra.mxu1 %v1628_v36 }
 0x167   : > { %1454 = vmatprep.subr.bf16.mxu1 %v1863_v0 }
 0x16a   : > { %1455 = vmatpush3.bf16.msra.mxu1 %v1629_v37 }
 0x16b   : > { %1456 = vmatprep.subr.bf16.mxu1 %v1863_v0 }
 0x16e   : > { %1457 = vmatpush3.bf16.msra.mxu1 %v1630_v38 }
 0x16f   : > { %1458 = vmatprep.subr.bf16.mxu1 %v1863_v0 }
 0x172   : > { %1459 = vmatpush3.bf16.msra.mxu1 %v1631_v49 }
 0x173   : > { %1460 = vmatprep.subr.bf16.mxu1 %v1863_v0 }
 0x176   : > { %1461 = vmatpush3.bf16.msra.mxu1 %v1632_v50 }
 0x177   : > { %1462 = vmatprep.subr.bf16.mxu1 %v1863_v0 }
 0x17a   : > { %1463 = vmatpush3.bf16.msra.mxu1 %v1633_v51 }
 0x17b   : > { %1488 = vmatprep.subr.bf16.mxu1 %v1863_v0 }
 0x21d   : > { %v638_v40 = vpop.f32.mrf.mxu1 }
 0x21e   : > { %v639_v42 = vadd.f32 %v1271_v39, %v638_v40 }
 0x21f   : > { %v1426_v41 = vpop.f32.mrf.mxu1 }
 0x220   : > { %v645_v46 = vmax.f32 %v639_v42, 0.0 }
 0x221   : > { %v641_v43 = vpop.f32.mrf.mxu1 }
 0x222   : > { %v642_v44 = vadd.f32 %v1271_v39, %v641_v43 }
 0x223   : > { %v1427_v45 = vpop.f32.mrf.mxu1 }
 0x224   : > { %v646_v47 = vmax.f32 %v642_v44, 0.0 }
 0x226   : > { %v647_v48 = vpack.c.bf16 %v646_v47, %v645_v46 }
 0x228   : > { %1445 = vmatmul.mubr.bf16.vlgmr.msra.gmra.mxu0 %v647_v48 }
 0x229   : > { %1484 = vmatprep.mubr.msk.bf16.mxu0 %vm1864_vm0, %v1863_v0  ;;  %1469 = vmatpush3.bf16.msra.mxu0 %v1634_v52 }
 0x22a   : > { %1470 = vmatprep.subr.bf16.mxu0 %v1863_v0 }
 0x22d   : > { %1471 = vmatpush3.bf16.msra.mxu0 %v1635_v53 }
 0x22e   : > { %1472 = vmatprep.subr.bf16.mxu0 %v1863_v0 }
 0x231   : > { %1473 = vmatpush3.bf16.msra.mxu0 %v1636_v54 }
 0x232   : > { %1474 = vmatprep.subr.bf16.mxu0 %v1863_v0 }
 0x235   : > { %1475 = vmatpush3.bf16.msra.mxu0 %v1637_v55 }
 0x236   : > { %1476 = vmatprep.subr.bf16.mxu0 %v1863_v0 }
 0x239   : > { %1477 = vmatpush3.bf16.msra.mxu0 %v1638_v56 }
 0x23a   : > { %1478 = vmatprep.subr.bf16.mxu0 %v1863_v0 }
 0x23d   : > { %1479 = vmatpush3.bf16.msra.mxu0 %v1639_v4 }
 0x23e   : > { %1480 = vmatprep.subr.bf16.mxu0 %v1863_v0 }
 0x241   : > { %1481 = vmatpush3.bf16.msra.mxu0 %v1640_v5 }
 0x242   : > { %1482 = vmatprep.subr.bf16.mxu0 %v1863_v0 }
 0x245   : > { %1483 = vmatpush3.bf16.msra.mxu0 %v1641_v6 }
 0x2e8   : > { %v753_v58 = vpop.f32.mrf.mxu0 }
 0x2e9   : > { %v754_v60 = vadd.f32 %v1280_v57, %v753_v58 }
 0x2ea   : > { %v1446_v59 = vpop.f32.mrf.mxu0 }
 0x2eb   : > { %v760_v1 = vadd.f32 %v754_v60, %v2129_v27 }
 0x2ec   : > { %v756_v61 = vpop.f32.mrf.mxu0 }
 0x2ed   : > { %v757_v62 = vadd.f32 %v1280_v57, %v756_v61 }
 0x2ee   : > { %v1447_v63 = vpop.f32.mrf.mxu0 }
 0x2ef   : > { %v761_v2 = vadd.f32 %v757_v62, %v2131_v28 }
 0x2f1   : > { %v762_v3 = vpack.c.bf16 %v761_v2, %v760_v1 }
 0x2f3   : > { %1465 = vmatmul.mubr.bf16.vlgmr.msra.gmra.mxu1 %v762_v3 }
 0x2f4   : > { %1504 = vmatprep.mubr.msk.bf16.mxu1 %vm1864_vm0, %v1863_v0  ;;  %1489 = vmatpush3.bf16.msra.mxu1 %v1642_v7 }
 0x2f5   : > { %1490 = vmatprep.subr.bf16.mxu1 %v1863_v0 }
 0x2f8   : > { %1491 = vmatpush3.bf16.msra.mxu1 %v1643_v8 }
 0x2f9   : > { %1492 = vmatprep.subr.bf16.mxu1 %v1863_v0 }
 0x2fc   : > { %1493 = vmatpush3.bf16.msra.mxu1 %v1644_v9 }
 0x2fd   : > { %1494 = vmatprep.subr.bf16.mxu1 %v1863_v0 }
 0x300   : > { %1495 = vmatpush3.bf16.msra.mxu1 %v1645_v10 }
 0x301   : > { %1496 = vmatprep.subr.bf16.mxu1 %v1863_v0 }
 0x304   : > { %1497 = vmatpush3.bf16.msra.mxu1 %v1646_v11 }
 0x305   : > { %1498 = vmatprep.subr.bf16.mxu1 %v1863_v0 }
 0x308   : > { %1499 = vmatpush3.bf16.msra.mxu1 %v1647_v22 }
 0x309   : > { %1500 = vmatprep.subr.bf16.mxu1 %v1863_v0 }
 0x30c   : > { %1501 = vmatpush3.bf16.msra.mxu1 %v1648_v23 }
 0x30d   : > { %1502 = vmatprep.subr.bf16.mxu1 %v1863_v0 }
 0x310   : > { %1503 = vmatpush3.bf16.msra.mxu1 %v1649_v24 }
 0x3b3   : > { %v870_v13 = vpop.f32.mrf.mxu1 }
 0x3b4   : > { %v871_v15 = vadd.f32 %v1290_v12, %v870_v13 }
 0x3b5   : > { %v1466_v14 = vpop.f32.mrf.mxu1 }
 0x3b6   : > { %v877_v19 = vmax.f32 %v871_v15, 0.0 }
 0x3b7   : > { %v873_v16 = vpop.f32.mrf.mxu1 }
 0x3b8   : > { %v874_v17 = vadd.f32 %v1290_v12, %v873_v16 }
 0x3b9   : > { %v1467_v18 = vpop.f32.mrf.mxu1 }
 0x3ba   : > { %v878_v20 = vmax.f32 %v874_v17, 0.0 }
 0x3bc   : > { %v879_v21 = vpack.c.bf16 %v878_v20, %v877_v19 }
 0x3be   : > { %1485 = vmatmul.mubr.bf16.vlgmr.msra.gmra.mxu0 %v879_v21 }
 0x47e   : > { %v987_v26 = vpop.f32.mrf.mxu0 }
 0x47f   : > { %v988_v28 = vadd.f32 %v1300_v25, %v987_v26 }
 0x480   : > { %v1486_v27 = vpop.f32.mrf.mxu0 }
 0x481   : > { %v994_v32 = vadd.f32 %v988_v28, %v760_v1 }
 0x482   : > { %v990_v29 = vpop.f32.mrf.mxu0 }
 0x483   : > { %v991_v30 = vadd.f32 %v1300_v25, %v990_v29 }
 0x484   : > { %v1487_v31 = vpop.f32.mrf.mxu0 }
 0x485   : > { %v995_v33 = vadd.f32 %v991_v30, %v761_v2 }
 0x487   : > { %v996_v34 = vpack.c.bf16 %v995_v33, %v994_v32 }
 0x489   : > { %1505 = vmatmul.mubr.bf16.vlgmr.msra.gmra.mxu1 %v996_v34 }
 0x549   : > { %v1102_v0 = vpop.f32.mrf.mxu1 }
 0x54a   : > { %v1103_v38 = vadd.f32 %v1309_v35, %v1102_v0 }
 0x54b   : > { %v1506_v36 = vpop.f32.mrf.mxu1 }
 0x54d   : > { %v1105_v37 = vpop.f32.mrf.mxu1 }
 0x54e   : > { %v1106_v39 = vadd.f32 %v1309_v35, %v1105_v37 }
 0x54f   : > { %v1507_v40 = vpop.f32.mrf.mxu1 }
 0x550   : > { %v1332_v41 = vpack.c.bf16 %v1106_v39, %v1103_v38 }
 0x552   : > { %1333 = vst [vmem:[%s408_s27] sm:$0xff] %v1332_v41  }
 0x553   : > { %1795 = shalt.err (!%p1792_p5)
}
 0x554   : > { %s1796_s28 = scalar_lea.hbm %s2191_s20, 128  ;;  %s1800_s22 = scalar_lea.hbm %s2243_s9, 256 }
 0x555   : > { %p1797_p6 = scmp.ne.s32.totalorder %s2191_s20, %s1796_s28  ;;  %p1801_p9 = scmp.lt.s32.totalorder %s2191_s20, %s2243_s9 }
 0x556   : > { %p1802_p2 = scmp.lt.s32.totalorder %s1800_s22, %s1796_s28 }
 0x557   : > { %p1798_p4 = pnand %p1797_p6, %p2270_p12 }
 0x558   : > { %p1803_p3 = por %p1802_p2, %p1801_p9 }
 0x559   : > { %p1799_p8 = pneg %p1798_p4 }
 0x55b   : > { %p1804_p10 = pnand %p1803_p3, %p1799_p8 }
 0x55d   : > { %1807 = shalt.err (!%p1804_p10)
}
 0x55e   : > { %s1866_s26 = smov 64   ;;  %s1867_s14 = smov 4  }
 0x55f   : > { %1526 = dma.vmem_to_hbm [thread:$0]  (%p2270_p12), %s2186_s15, 128, %s2191_s20, %s1120_s24, %s1866_s26, %s1866_s26, %s1867_s14  }
 0x560 PF: > { %s1148_s5 = sand.u32 1, %s1842_s30   ;;  %p2271_p7 = scmp.ne.s32.totalorder %s2254_s16, 0 }
 0x561   : > { %p2272_p1 = scmp.ge.s32.totalorder %s1854_s12, 2  ;;  %s1149_s13 = scalar_lea.sflag [#allocation4], %s1148_s5 }
 0x563   : > { %p1546_p13 = pnand %p2272_p1, %p2271_p7 }
 0x565   : > { %p1547_p0 = pneg %p1546_p13 }
 0x567   : > { %1837 = dma.done.wait (%p1547_p0), %s1149_s13, 128  }
 0x568   : > { %1839 = vsyncadd (%p1547_p0), %s1149_s13, 4294967168  ;;  %p24_p11 = scmp.ge.s32.totalorder %s2018_s18, 4   ;;  %s2273_s30 = smov %s1846_s10 }
 0x569   : > { %s2274_s10 = smov %s1850_s11  ;;  %s2275_s11 = smov %s2034_s23 }
 0x56a   : > { %s2276_s12 = smov %s2018_s18  ;;  %26 = sbr.rel (!%p24_p11) target bundleno = 11 (0xb), region = 121 }
 0x56f   :  { %1154 = vsyncpa [#allocation3], 1 }
 0x570   :  { %1156 = vsyncpa [#allocation3 + $0x1], 1 }
 0x571   :  { %1157 = vsyncpa [#allocation6], 1 }
 0x572   :  { %1158 = vsyncpa [#allocation9], 1 }
 0x573   :  { %1159 = vsyncpa [#allocation4], 1 }
 0x574   :  { %1161 = vsyncpa [#allocation4 + $0x1], 1 }

</bundles_post_ra>
